<compile_context>
chip_gen: v6e
topology: v6e:2x2x1
jax: 0.10.0
libtpu: 0.0.40
codegen_flags: <defaults>
</compile_context>

<pallas_src>
import jax
import jax.numpy as jnp
from jax.experimental import pallas as pl
from jax.experimental.pallas import tpu as pltpu


def _linear_kernel(xt_ref, w_ref, b_ref, o_ref):
    # xt_ref: (D, TN) lane-dense feature columns (x transposed), VMEM, x's dtype
    # w_ref:  (1, D)  weight row in x's dtype, VMEM
    # b_ref:  (1,)    f32 bias, SMEM
    # o_ref:  (1, TN) f32 lane-dense output tile
    # Canonical MXU (M, K) @ (K, N): no lane padding, no in-kernel transpose.
    y = jnp.dot(w_ref[...], xt_ref[...], preferred_element_type=jnp.float32)
    # Bias: scalar read from SMEM, broadcast add on the VPU.
    o_ref[...] = (y + b_ref[0]).astype(o_ref.dtype)


def _choose_tile_n(n: int, max_tile_n: int) -> int:
    """Largest 128-aligned tile <= min(n, max_tile_n); full array when n < 128."""
    if n < 128:
        return n  # single full-array block (block dims == array dims is legal)
    max_aligned = max(128, (max_tile_n // 128) * 128)  # defensively 128-align
    return min(max_aligned, (n // 128) * 128)          # never exceed the array


def polynomial_regression_forward_t(x_t, weight, bias, *, max_tile_n=32768):
    """y = x @ W^T + b from the lane-dense transposed feature matrix x_t = x.T (D, N)."""
    d, n = x_t.shape
    tile_n = _choose_tile_n(n, max_tile_n)
    num_tiles = pl.cdiv(n, tile_n)
    n_out = num_tiles * tile_n  # pad only the tiny output allocation, never x

    w_row = weight.reshape(1, d).astype(x_t.dtype)  # MXU takes bf16/f32 natively
    b = bias.reshape(1).astype(jnp.float32)

    itemsize = x_t.dtype.itemsize
    cost = pl.CostEstimate(
        flops=2 * n * d,
        transcendentals=0,
        bytes_accessed=n * d * itemsize + n * 4 + d * itemsize + 4,
    )

    # TODO(synk): on v7x, if a profile still shows exposed input DMA at these
    # tile sizes, add pipeline_mode=pl.Buffered(3) to the x_t BlockSpec.
    out = pl.pallas_call(
        _linear_kernel,
        out_shape=jax.ShapeDtypeStruct((1, n_out), jnp.float32),
        grid_spec=pltpu.PrefetchScalarGridSpec(
            num_scalar_prefetch=0,
            grid=(num_tiles,),
            in_specs=[
                pl.BlockSpec((d, tile_n), lambda i: (0, i)),        # stream columns
                pl.BlockSpec((1, d), lambda i: (0, 0)),             # weight row
                pl.BlockSpec(memory_space=pltpu.MemorySpace.SMEM),  # bias scalar
            ],
            out_specs=pl.BlockSpec((1, tile_n), lambda i: (0, i)),  # lane-dense
        ),
        compiler_params=pltpu.CompilerParams(
            # Independent tiles: v7x's two TensorCores split the grid;
            # measured no-op on single-core v5e/v6e.
            dimension_semantics=("parallel",),
        ),
        cost_estimate=cost,
    )(x_t, w_row, b)

    return out[0, :n].reshape(n, 1)


def polynomial_regression_forward(x, weight, bias, *, max_tile_n=32768):
    """Convenience (N, D) entry point: y = x @ W^T + b.

    Transposes x once (an HBM copy).
    TODO(synk): emit the PolynomialFeatures matrix directly in (D, N) layout at
    data-prep time and call polynomial_regression_forward_t to avoid this copy.
    """
    return polynomial_regression_forward_t(
        jnp.transpose(x), weight, bias, max_tile_n=max_tile_n
    )


if __name__ == "__main__":
    # 2 raw features expanded with PolynomialFeatures(degree=5, include_bias=False)
    # -> C(2+5, 5) - 1 = 20 polynomial features.
    input_dim = 20
    batch = 8

    key = jax.random.PRNGKey(0)
    kx, kw, kb, kx2 = jax.random.split(key, 4)

    x = jax.random.normal(kx, (batch, input_dim), dtype=jnp.float32)

    # Deterministic init mimicking nn.Linear default: U(-1/sqrt(D), 1/sqrt(D)).
    bound = 1.0 / float(input_dim) ** 0.5
    weight = jax.random.uniform(kw, (1, input_dim), jnp.float32, -bound, bound)
    bias = jax.random.uniform(kb, (1,), jnp.float32, -bound, bound)

    out = jax.block_until_ready(polynomial_regression_forward(x, weight, bias))
    ref = x @ weight.T + bias
    assert out.shape == (batch, 1)
    assert jnp.allclose(out, ref, atol=1e-5, rtol=1e-5)

    # Ragged batch (not a multiple of 128): exercises the multi-tile grid and the
    # partial last input block (no input padding; only output alloc is padded).
    n2 = 300
    x2 = jax.random.normal(kx2, (n2, input_dim), dtype=jnp.float32)
    out2 = jax.block_until_ready(polynomial_regression_forward(x2, weight, bias))
    ref2 = x2 @ weight.T + bias
    assert out2.shape == (n2, 1)
    assert jnp.allclose(out2, ref2, atol=1e-4, rtol=1e-4)

    # bf16 path: no in-kernel upcast, MXU bf16 x bf16 with f32 accumulation.
    out3 = jax.block_until_ready(
        polynomial_regression_forward(x2.astype(jnp.bfloat16), weight, bias)
    )
    assert out3.shape == (n2, 1)
    assert jnp.allclose(out3, ref2, atol=1e-1, rtol=5e-2)

    print("KERNEL_OK")
</pallas_src>

<mosaic_0001>
module attributes {stable_mosaic.version = 11 : i64} {
  func.func @_linear_kernel(%arg0: i32, %arg1: memref<20x8xf32, #tpu.memory_space<vmem>>, %arg2: memref<1x20xf32, #tpu.memory_space<vmem>>, %arg3: memref<1xf32, #tpu.memory_space<smem>>, %arg4: memref<1x8xf32, #tpu.memory_space<vmem>>) attributes {dimension_semantics = [#tpu.dimension_semantics<parallel>], iteration_bounds = array<i64: 1>, scalar_prefetch = 0 : i64, scratch_operands = 0 : i64, tpu.core_type = #tpu.core_type<tc>, window_params = [{transform_indices = @transform_0, window_bounds = array<i64: 20, 8>}, {pipeline_mode = #tpu.pipeline_mode<synchronous>, transform_indices = @transform_1, window_bounds = array<i64: 1, 20>}, {transform_indices = @transform_2, window_bounds = array<i64: 1>}, {transform_indices = @transform_3, window_bounds = array<i64: 1, 8>}]} {
    %c0 = arith.constant 0 : index
    %c0_0 = arith.constant 0 : index
    %0 = vector.load %arg2[%c0, %c0_0] : memref<1x20xf32, #tpu.memory_space<vmem>>, vector<1x20xf32>
    %c0_1 = arith.constant 0 : index
    %c0_2 = arith.constant 0 : index
    %1 = vector.load %arg1[%c0_1, %c0_2] : memref<20x8xf32, #tpu.memory_space<vmem>>, vector<20x8xf32>
    %cst = arith.constant dense<0.000000e+00> : vector<1x8xf32>
    %2 = tpu.matmul %0, %1, %cst {dimension_numbers = #tpu.dot_dimension_numbers<[1], [0], [0], [1], [0, 0, 1, 1], [], []>} : vector<1x20xf32>, vector<20x8xf32>, vector<1x8xf32> -> vector<1x8xf32>
    %c0_3 = arith.constant 0 : index
    %3 = memref.load %arg3[%c0_3] : memref<1xf32, #tpu.memory_space<smem>>
    %4 = vector.broadcast %3 : f32 to vector<1x8xf32>
    %5 = arith.addf %2, %4 : vector<1x8xf32>
    %c0_4 = arith.constant 0 : index
    %c0_5 = arith.constant 0 : index
    %6 = vector.load %arg4[%c0_4, %c0_5] : memref<1x8xf32, #tpu.memory_space<vmem>>, vector<1x8xf32>
    tpu.vector_store %arg4[%c0_4, %c0_5], %5 {strides = array<i32>} : memref<1x8xf32, #tpu.memory_space<vmem>>, vector<1x8xf32>,
    return
  }
  func.func @transform_0(%arg0: i32) -> (i32, i32) {
    %c0_i32 = arith.constant 0 : i32
    %c0_i32_0 = arith.constant 0 : i32
    return %c0_i32, %arg0 : i32, i32
  }
  func.func @transform_1(%arg0: i32) -> (i32, i32) {
    %c0_i32 = arith.constant 0 : i32
    %c0_i32_0 = arith.constant 0 : i32
    %c0_i32_1 = arith.constant 0 : i32
    return %c0_i32, %c0_i32_0 : i32, i32
  }
  func.func @transform_2(%arg0: i32) -> i32 {
    %c0_i32 = arith.constant 0 : i32
    %c0_i32_0 = arith.constant 0 : i32
    return %c0_i32 : i32
  }
  func.func @transform_3(%arg0: i32) -> (i32, i32) {
    %c0_i32 = arith.constant 0 : i32
    %c0_i32_0 = arith.constant 0 : i32
    return %c0_i32, %arg0 : i32, i32
  }
}

</mosaic_0001>

<bundles_post_ra>
// kernel: tpu_custom_call.1
= control target key start
LH: loop header
LB: loop body
LE: loop exit
PB: predicated region body
PF: predicated region fallthrough
CT: control target
= control target key end

     0   :  { %vm26_vm0 = vcmask 1043456   ;;  %v156_v1 = vmov 0.0   ;;  %s197_s0 = inlined_call_operand.vmem [shape: f32[20,8], index: 0, kind: input, shape index: {}]   ;;  %s198_s1 = inlined_call_operand.vmem [shape: f32[1,20], index: 1, kind: input, shape index: {}]   ;;  %s199_s2 = inlined_call_operand.<no memory space> [shape: f32[1], index: 2, kind: input, shape index: {}]   ;;  %s200_s3 = inlined_call_operand.hbm [shape: f32[1,8], index: 3, kind: output, shape index: {}]  }
   0x1   :  { %v19_v0 = vld [vmem:[%s197_s0 + $0x10] sm:$0xf]  ;;  %122 = vmatprep.subr.mxu0 %v156_v1  ;;  %v18_v2 = vld [vmem:[%s197_s0 + $0x8] sm:$0xff] }
   0x2   :  { %9 = vsyncpa [#allocation4], 0  ;;  %123 = vmatpush3.msk.msra.mxu0 %vm26_vm0, %v19_v0  ;;  %vm157_vm1 = vmmov 0   ;;  %v17_v3 = vld [vmem:[%s197_s0] sm:$0xff]  ;;  %vm22_vm2 = vcmask 162816   ;;  %v21_v5 = vstv %s199_s2  ;;  %s158_s22 = smov [#allocation3]  }
   0x3   :  { %128 = vmatprep.mubr.msk.f32.mxu0 %vm157_vm1, %v156_v1  ;;  %124 = vmatprep.subr.mxu0 %v156_v1  ;;  %v16_v4 = vld [vmem:[%s198_s1] sm:$0x1]  ;;  %s108_s23 = sshll.u32 %s158_s22, 4  ;;  %vm100_vm3 = vcmask 57344   ;;  %s109_s23 = int_to_ptr.vmem [resolvable:$true] %s108_s23 }
   0x4   :  { %125 = vmatpush3.msra.mxu0 %v18_v2  ;;  %s134_s0 = scalar_lea.vmem %s109_s23, 16  ;;  %s138_s24 = scalar_lea.vmem %s109_s23, 32 }
   0x5   :  { %126 = vmatprep.subr.mxu0 %v156_v1  ;;  %p135_p0 = scmp.ne.s32.totalorder %s109_s23, %s134_s0  ;;  %p139_p1 = scmp.lt.s32.totalorder %s109_s23, %s109_s23 }
   0x6   :  { %127 = vmatpush3.msra.mxu0 %v17_v3  ;;  %p140_p2 = scmp.lt.s32.totalorder %s138_s24, %s134_s0 }
   0x7   :  { %129 = vmatmul.mubr.msk.f32.vlgmr.msra.gmra.mxu0 %vm22_vm2, %v16_v4 }
   0x8   :  { %p141_p3 = por %p140_p2, %p139_p1 }
   0xa   :  { %p142_p4 = pnand %p141_p3, %p135_p0 }
  0xc7   :  { %v96_v6 = vpop.f32.mrf.mxu0 }
  0xc8   :  { %v97_v7 = vadd.f32 %v96_v6, %v21_v5 }
  0xc9   :  { %v130_v8 = vpop.f32.mrf.mxu0 }
  0xca   :  { %101 = vst.msk [vmem:[#allocation3] sm:$0x1] %vm100_vm3, %v97_v7 }
  0xcb   :  { %145 = shalt.err (!%p142_p4)
}
  0xcc   :  { %111 = dma.vmem_to_hbm [thread:$0]  %s109_s23, 16, %s200_s3, [#allocation4]  }
  0xcd   :  { %154 = dma.done.wait [#allocation4], 16  }
  0xce   :  { %155 = vsyncadd [#allocation4], 4294967280 }
  0xcf   :  { %115 = vsyncpa [#allocation4], 1 }

</bundles_post_ra>
